<compile_context>
chip_gen: v5e
topology: v5e:2x2
jax: 0.10.0
libtpu: 0.0.40
codegen_flags: <defaults>
</compile_context>

<pallas_src>
import jax
import jax.numpy as jnp
import numpy as np
from jax.experimental import pallas as pl
from jax.experimental.pallas import tpu as pltpu


# ------------------------- helpers -------------------------

def _round_up(v, m):
    return (v + m - 1) // m * m


def _plan_weight_dim(dim, unit, cap):
    """Tile for a weight dimension: multiple of `unit`, <= cap.

    Minimizes the padded extent (weight padding = wasted HBM bandwidth every
    forward), tie-broken towards the larger tile.  Returns (tile, padded_dim).
    """
    padded = _round_up(dim, unit)
    if padded <= cap:
        return padded, padded          # whole (lane-padded) dim in one tile
    best_t, best_p = unit, None
    t = (cap // unit) * unit
    while t >= unit:
        p = _round_up(dim, t)
        if best_p is None or p < best_p:
            best_t, best_p = t, p
        t -= unit
    return best_t, best_p


# ------------------------- kernel -------------------------

def _make_dense_kernel(*, act_fn, use_bias, use_scratch, nk):
    """Fused matmul + bias + activation kernel, specialized at trace time."""

    def kernel(*refs):
        idx = 0
        x_ref = refs[idx]; idx += 1           # (tm, tk)
        w_ref = refs[idx]; idx += 1           # (tk, tn)
        b_ref = None
        if use_bias:
            b_ref = refs[idx]; idx += 1       # (1, tn)
        o_ref = refs[idx]; idx += 1           # (tm, tn)
        acc_ref = refs[idx] if use_scratch else o_ref

        def finalize(y):                      # y is f32 (tm, tn)
            if use_bias:
                y = y + b_ref[...].astype(jnp.float32)
            if act_fn is not None:
                y = act_fn(y)
            return y.astype(o_ref.dtype)

        prod = jnp.dot(x_ref[...], w_ref[...],
                       preferred_element_type=jnp.float32)

        if nk == 1:
            # single K step: no accumulation state at all
            o_ref[...] = finalize(prod)
            return

        k = pl.program_id(2)

        @pl.when(k == 0)
        def _():
            acc_ref[...] = prod.astype(acc_ref.dtype)

        @pl.when(k > 0)
        def _():
            acc_ref[...] += prod.astype(acc_ref.dtype)

        @pl.when(k == nk - 1)
        def _():
            o_ref[...] = finalize(acc_ref[...].astype(jnp.float32))

    return kernel


# ------------------------- wrapper -------------------------

def dense_forward(x, w_t, b, *, act_fn, tn, tk, n_out, out_dtype=None,
                  compute_dtype=None, tm_cap=512,
                  vmem_limit_bytes=32 * 1024 * 1024):
    """y = act(x @ w_t + b).

    x:   (M, K)   activations (unpadded).
    w_t: (Kp, Np) weight, pre-transposed + zero-padded (+ pre-cast) at init.
    b:   (1, Np)  pre-padded bias, or None.
    """
    M, K = x.shape
    Kp, Np = w_t.shape
    assert K <= Kp and Kp % tk == 0 and Np % tn == 0
    use_bias = b is not None
    if out_dtype is None:
        out_dtype = x.dtype

    # --- M tiling: one block for typical batches => weight streamed once. ---
    m_unit = 8
    if compute_dtype is not None:
        itemsize = jnp.dtype(compute_dtype).itemsize
        m_unit = 32 if itemsize == 1 else (16 if itemsize == 2 else 8)
    tm = min(tm_cap, _round_up(M, m_unit))
    Mp = _round_up(M, tm)

    # --- keep >= 2 parallel blocks so both v7x TensorCores get work. ---
    if (Mp // tm) * (Np // tn) < 2 and Np >= 256:
        t = (Np // 2) // 128 * 128
        while t >= 128 and Np % t:
            t -= 128
        if t >= 128:
            tn = t

    # --- pad/cast activations only (weights/bias already prepped at init). ---
    if (Mp, Kp) != (M, K):
        x = jnp.pad(x, ((0, Mp - M), (0, Kp - K)))
    if compute_dtype is not None and x.dtype != compute_dtype:
        x = x.astype(compute_dtype)

    nk = Kp // tk
    grid = (Mp // tm, Np // tn, nk)

    # f32 outputs accumulate in-place in the resident output block; scratch
    # accumulator only when the output dtype cannot hold partial sums.
    use_scratch = (nk > 1) and (out_dtype != jnp.float32)

    kernel = _make_dense_kernel(act_fn=act_fn, use_bias=use_bias,
                                use_scratch=use_scratch, nk=nk)

    in_specs = [
        pl.BlockSpec((tm, tk), lambda i, j, k: (i, k)),
        pl.BlockSpec((tk, tn), lambda i, j, k: (k, j)),
    ]
    args = [x, w_t]
    if use_bias:
        in_specs.append(pl.BlockSpec((1, tn), lambda i, j, k: (0, j)))
        args.append(b)

    scratch_shapes = [pltpu.VMEM((tm, tn), jnp.float32)] if use_scratch else []

    out = pl.pallas_call(
        kernel,
        out_shape=jax.ShapeDtypeStruct((Mp, Np), out_dtype),
        grid_spec=pltpu.PrefetchScalarGridSpec(
            num_scalar_prefetch=0,
            grid=grid,
            in_specs=in_specs,
            out_specs=pl.BlockSpec((tm, tn), lambda i, j, k: (i, j)),
            scratch_shapes=scratch_shapes),
        compiler_params=pltpu.CompilerParams(
            dimension_semantics=("parallel", "parallel", "arbitrary"),
            vmem_limit_bytes=vmem_limit_bytes),
    )(*args)

    if (Mp, Np) != (M, n_out):
        out = out[:M, :n_out]
    return out


class DenseLayer:
    """JAX/Pallas port of the PyTorch DenseLayer: y = act(x @ W.T + b)."""

    def __init__(self, in_features, out_features, bias=True, std_init=0.01,
                 act="relu", *, key=None, dtype=jnp.float32,
                 compute_dtype=None, tn_cap=512, tk_cap=1024):
        if key is None:
            key = jax.random.PRNGKey(0)
        kw, kb = jax.random.split(key)
        # torch: weight (out, in), bias (out,), both ~ N(0, std_init)
        # TODO(synk): same distribution as torch's normal_, not the same RNG stream.
        self.weight = (std_init *
                       jax.random.normal(kw, (out_features, in_features), dtype))
        self.use_bias = bool(bias)
        self.bias = (std_init * jax.random.normal(kb, (out_features,), dtype)
                     if self.use_bias else None)
        self.in_features = in_features
        self.out_features = out_features
        self.compute_dtype = compute_dtype
        self._out_dtype = dtype

        # One-time weight prep: transpose, zero-pad to tile multiples and
        # (optionally) cast.  No per-forward HBM pass over static params.
        self._tk, kp = _plan_weight_dim(in_features, 128, tk_cap)
        self._tn, np_out = _plan_weight_dim(out_features, 128, tn_cap)
        w_t = self.weight.T                                   # (K, N)
        if (kp, np_out) != (in_features, out_features):
            w_t = jnp.pad(w_t, ((0, kp - in_features),
                                (0, np_out - out_features)))
        if compute_dtype is not None:
            w_t = w_t.astype(compute_dtype)
        self._w_t = w_t
        if self.use_bias:
            b2 = jnp.reshape(self.bias, (1, out_features))
            if np_out != out_features:
                b2 = jnp.pad(b2, ((0, 0), (0, np_out - out_features)))
            self._b = b2
        else:
            self._b = None

        if act is None or act == "identity":
            self._act_fn = None
        elif act == "relu":
            self._act_fn = lambda y: jnp.maximum(y, 0.0)
        elif callable(act):
            self._act_fn = act
        else:
            raise NotImplementedError(act)

    def __call__(self, x):
        return dense_forward(
            x, self._w_t, self._b,
            act_fn=self._act_fn, tn=self._tn, tk=self._tk,
            n_out=self.out_features, out_dtype=self._out_dtype,
            compute_dtype=self.compute_dtype)


# ------------------------- demo / check -------------------------

if __name__ == "__main__":
    key = jax.random.PRNGKey(0)
    k1, k2, k3, k4, k5 = jax.random.split(key, 5)

    # small shape consistent with the module: batch=8, in=32, out=64
    layer = DenseLayer(32, 64, key=k1)
    x = jax.random.normal(k2, (8, 32), jnp.float32)
    y = layer(x)

    # larger shape exercising the grid / padding / megacore-split path
    layer2 = DenseLayer(512, 384, key=k3)
    x2 = jax.random.normal(k4, (256, 512), jnp.float32)
    y2 = layer2(x2)

    # bf16 compute path (weights cast once at init, f32 accumulation/output)
    layer3 = DenseLayer(512, 384, key=k3, compute_dtype=jnp.bfloat16)
    x3 = jax.random.normal(k5, (256, 512), jnp.float32)
    y3 = layer3(x3)

    jax.block_until_ready((y, y2, y3))

    # pure-JAX references
    ref = jnp.maximum(x @ layer.weight.T + layer.bias, 0.0)
    ref2 = jnp.maximum(x2 @ layer2.weight.T + layer2.bias, 0.0)
    ref3 = jnp.maximum(x3 @ layer3.weight.T + layer3.bias, 0.0)
    np.testing.assert_allclose(np.asarray(y), np.asarray(ref),
                               rtol=1e-5, atol=1e-5)
    np.testing.assert_allclose(np.asarray(y2), np.asarray(ref2),
                               rtol=1e-4, atol=1e-5)
    np.testing.assert_allclose(np.asarray(y3), np.asarray(ref3),
                               rtol=1e-1, atol=3e-2)   # bf16 compute tolerance

    print("KERNEL_OK")
</pallas_src>

<mosaic_0001>
module attributes {stable_mosaic.version = 11 : i64} {
  func.func @kernel(%arg0: i32, %arg1: i32, %arg2: i32, %arg3: memref<8x128xf32, #tpu.memory_space<vmem>>, %arg4: memref<128x128xf32, #tpu.memory_space<vmem>>, %arg5: memref<1x128xf32, #tpu.memory_space<vmem>>, %arg6: memref<8x128xf32, #tpu.memory_space<vmem>>) attributes {dimension_semantics = [#tpu.dimension_semantics<parallel>, #tpu.dimension_semantics<parallel>, #tpu.dimension_semantics<arbitrary>], iteration_bounds = array<i64: 1, 1, 1>, scalar_prefetch = 0 : i64, scratch_operands = 0 : i64, tpu.core_type = #tpu.core_type<tc>, window_params = [{transform_indices = @transform_0, window_bounds = array<i64: 8, 128>}, {transform_indices = @transform_1, window_bounds = array<i64: 128, 128>}, {transform_indices = @transform_2, window_bounds = array<i64: 1, 128>}, {transform_indices = @transform_3, window_bounds = array<i64: 8, 128>}]} {
    %c0 = arith.constant 0 : index
    %c0_0 = arith.constant 0 : index
    %0 = vector.load %arg3[%c0, %c0_0] : memref<8x128xf32, #tpu.memory_space<vmem>>, vector<8x128xf32>
    %c0_1 = arith.constant 0 : index
    %c0_2 = arith.constant 0 : index
    %1 = vector.load %arg4[%c0_1, %c0_2] : memref<128x128xf32, #tpu.memory_space<vmem>>, vector<128x128xf32>
    %cst = arith.constant dense<0.000000e+00> : vector<8x128xf32>
    %2 = tpu.matmul %0, %1, %cst {dimension_numbers = #tpu.dot_dimension_numbers<[1], [0], [0], [1], [0, 0, 1, 1], [], []>} : vector<8x128xf32>, vector<128x128xf32>, vector<8x128xf32> -> vector<8x128xf32>
    %c0_3 = arith.constant 0 : index
    %c0_4 = arith.constant 0 : index
    %3 = vector.load %arg5[%c0_3, %c0_4] : memref<1x128xf32, #tpu.memory_space<vmem>>, vector<1x128xf32>
    %4 = vector.broadcast %3 : vector<1x128xf32> to vector<8x128xf32>
    %5 = arith.addf %2, %4 : vector<8x128xf32>
    %cst_5 = arith.constant 0.000000e+00 : f32
    %6 = vector.broadcast %cst_5 : f32 to vector<8x128xf32>
    %7 = arith.maximumf %5, %6 : vector<8x128xf32>
    %c0_6 = arith.constant 0 : index
    %c0_7 = arith.constant 0 : index
    %8 = vector.load %arg6[%c0_6, %c0_7] : memref<8x128xf32, #tpu.memory_space<vmem>>, vector<8x128xf32>
    tpu.vector_store %arg6[%c0_6, %c0_7], %7 {strides = array<i32>} : memref<8x128xf32, #tpu.memory_space<vmem>>, vector<8x128xf32>,
    return
  }
  func.func @transform_0(%arg0: i32, %arg1: i32, %arg2: i32) -> (i32, i32) {
    %c0_i32 = arith.constant 0 : i32
    return %arg0, %arg2 : i32, i32
  }
  func.func @transform_1(%arg0: i32, %arg1: i32, %arg2: i32) -> (i32, i32) {
    %c0_i32 = arith.constant 0 : i32
    return %arg2, %arg1 : i32, i32
  }
  func.func @transform_2(%arg0: i32, %arg1: i32, %arg2: i32) -> (i32, i32) {
    %c0_i32 = arith.constant 0 : i32
    %c0_i32_0 = arith.constant 0 : i32
    return %c0_i32, %arg1 : i32, i32
  }
  func.func @transform_3(%arg0: i32, %arg1: i32, %arg2: i32) -> (i32, i32) {
    %c0_i32 = arith.constant 0 : i32
    return %arg0, %arg1 : i32, i32
  }
}

</mosaic_0001>

<bundles_post_ra>
// kernel: tpu_custom_call.1
= control target key start
LH: loop header
LB: loop body
LE: loop exit
PB: predicated region body
PF: predicated region fallthrough
CT: control target
= control target key end

     0   :  { %8 = vsyncpa [#allocation3], 0  ;;  %s227_s0 = inlined_call_operand.hbm [shape: f32[8,128], index: 0, kind: input, shape index: {}]   ;;  %s228_s1 = inlined_call_operand.hbm [shape: f32[128,128], index: 1, kind: input, shape index: {}]   ;;  %s229_s2 = inlined_call_operand.vmem [shape: f32[1,128], index: 2, kind: input, shape index: {}]   ;;  %s230_s3 = inlined_call_operand.hbm [shape: f32[8,128], index: 3, kind: output, shape index: {}]  }
   0x1   :  { %9 = vsyncpa [#allocation6], 0 }
   0x2   :  { %10 = vsyncpa [#allocation4], 0  ;;  %s16_s14 = sshll.u32 %s227_s0, 4  ;;  %s190_s15 = smov [#allocation2]   ;;  %s17_s14 = int_to_ptr.hbm [resolvable:$true] %s16_s14 }
   0x3   :  { %s18_s16 = sshll.u32 %s190_s15, 4  ;;  %s26_s19 = sshll.u32 %s228_s1, 4  ;;  %s19_s16 = int_to_ptr.vmem [resolvable:$true] %s18_s16  ;;  %s27_s19 = int_to_ptr.hbm [resolvable:$true] %s26_s19 }
   0x4   :  { %21 = dma.hbm_to_vmem [thread:$0]  %s17_s14, 128, %s19_s16, [#allocation3]  }
   0x5   :  { %s191_s20 = smov [#allocation5]   ;;  %s192_s22 = smov 128  }
   0x6   :  { %s28_s21 = sshll.u32 %s191_s20, 4  ;;  %s193_s23 = smov 8   ;;  %s29_s21 = int_to_ptr.vmem [resolvable:$true] %s28_s21 }
   0x7   :  { %34 = dma.hbm_to_vmem [thread:$0]  %s27_s19, 2048, %s29_s21, [#allocation6], %s192_s22, %s192_s22, %s193_s23  }
   0x8   :  { %184 = dma.done.wait [#allocation3], 128  }
   0x9   :  { %185 = vsyncadd [#allocation3], 4294967168 }
   0xa   :  { %186 = dma.done.wait [#allocation6], 2048  }
   0xb   :  { %187 = vsyncadd [#allocation6], 4294965248  ;;  %v61_v0 = vld [vmem:[#allocation5 + $0x78] sm:$0xff]  ;;  %v60_v1 = vld [vmem:[#allocation5 + $0x70] sm:$0xff]  ;;  %s194_s24 = smov [#allocation7]   ;;  %s95_s28 = sshll.u32 %s230_s3, 4  ;;  %s96_s28 = int_to_ptr.hbm [resolvable:$true] %s95_s28 }
   0xc   :  { %66 = vmatpush.msra.mxu0 %v61_v0  ;;  %v59_v2 = vld [vmem:[#allocation5 + $0x68] sm:$0xff]  ;;  %v58_v3 = vld [vmem:[#allocation5 + $0x60] sm:$0xff]  ;;  %v57_v4 = vld [vmem:[#allocation5 + $0x58] sm:$0xff]  ;;  %s93_s25 = sshll.u32 %s194_s24, 4  ;;  %s94_s25 = int_to_ptr.vmem [resolvable:$true] %s93_s25 }
   0xd   :  { %v56_v5 = vld [vmem:[#allocation5 + $0x50] sm:$0xff]  ;;  %v55_v6 = vld [vmem:[#allocation5 + $0x48] sm:$0xff]  ;;  %v54_v7 = vld [vmem:[#allocation5 + $0x40] sm:$0xff] }
   0xe   :  { %67 = vmatpush.msra.mxu0 %v60_v1  ;;  %v53_v8 = vld [vmem:[#allocation5 + $0x38] sm:$0xff]  ;;  %v52_v9 = vld [vmem:[#allocation5 + $0x30] sm:$0xff]  ;;  %v51_v10 = vld [vmem:[#allocation5 + $0x28] sm:$0xff] }
   0xf   :  { %v50_v11 = vld [vmem:[#allocation5 + $0x20] sm:$0xff]  ;;  %v49_v12 = vld [vmem:[#allocation5 + $0x18] sm:$0xff]  ;;  %v48_v13 = vld [vmem:[#allocation5 + $0x10] sm:$0xff] }
  0x10   :  { %68 = vmatpush.msra.mxu0 %v59_v2  ;;  %v47_v14 = vld [vmem:[#allocation5 + $0x8] sm:$0xff]  ;;  %v46_v15 = vld [vmem:[#allocation5] sm:$0xff]  ;;  %v45_v16 = vld [vmem:[#allocation2] sm:$0xff] }
  0x11   :  { %v111_v17 = vld [vmem:[%s229_s2] ss:$0 sm:$0xff] }
  0x12   :  { %69 = vmatpush.msra.mxu0 %v58_v3 }
  0x14   :  { %70 = vmatpush.msra.mxu0 %v57_v4 }
  0x16   :  { %71 = vmatpush.msra.mxu0 %v56_v5 }
  0x18   :  { %72 = vmatpush.msra.mxu0 %v55_v6 }
  0x1a   :  { %73 = vmatpush.msra.mxu0 %v54_v7 }
  0x1c   :  { %74 = vmatpush.msra.mxu0 %v53_v8 }
  0x1e   :  { %75 = vmatpush.msra.mxu0 %v52_v9 }
  0x20   :  { %76 = vmatpush.msra.mxu0 %v51_v10 }
  0x22   :  { %77 = vmatpush.msra.mxu0 %v50_v11 }
  0x24   :  { %78 = vmatpush.msra.mxu0 %v49_v12 }
  0x26   :  { %79 = vmatpush.msra.mxu0 %v48_v13 }
  0x28   :  { %80 = vmatpush.msra.mxu0 %v47_v14 }
  0x2a   :  { %81 = vmatpush.msra.mxu0 %v46_v15 }
  0x2b   :  { %82 = vmatmul.f32.vlgmr.msra.gmra.mxu0 %v45_v16 }
  0xa8   :  { %v83_v18 = vpop.f32.mrf.mxu0 }
  0xa9   :  { %v84_v19 = vadd.f32 %v111_v17, %v83_v18 }
  0xab   :  { %v86_v20 = vmax.f32 %v84_v19, 0.0 }
  0xad   :  { %87 = vst [vmem:[#allocation7] sm:$0xff] %v86_v20 }
  0xae   :  { %98 = dma.vmem_to_hbm [thread:$0]  %s94_s25, 128, %s96_s28, [#allocation4]  }
  0xaf   :  { %188 = dma.done.wait [#allocation4], 128  }
  0xb0   :  { %189 = vsyncadd [#allocation4], 4294967168 }
  0xb1   :  { %103 = vsyncpa [#allocation3], 1 }
  0xb2   :  { %104 = vsyncpa [#allocation6], 1 }
  0xb3   :  { %105 = vsyncpa [#allocation4], 1 }

</bundles_post_ra>
